<compile_context>
chip_gen: v6e
topology: v6e:2x2x1
jax: 0.10.0
libtpu: 0.0.40
codegen_flags: <defaults>
</compile_context>

<pallas_src>
import functools

import jax
import jax.numpy as jnp
import numpy as np
from jax.experimental import pallas as pl
from jax.experimental.pallas import tpu as pltpu


def _round_up(x, m):
    return ((x + m - 1) // m) * m


def _cdiv(a, b):
    return (a + b - 1) // b


# ---------------------------------------------------------------------------
# Pallas kernel: fused acceptor+donor conv heads + log-softmax + null combine
# ---------------------------------------------------------------------------
def _splice_kernel(xc_ref, xh_ref, w1_ref, b1_ref, w2_ref, b2_ref, o_ref):
    cin = xc_ref.shape[0]
    kc = w1_ref.shape[1]          # K * Cin (static)
    K = kc // cin
    tile = o_ref.shape[-1]

    # Halo-extended bf16 tile: lane-aligned concat of the tile + 128-lane halo.
    x_ext = jnp.concatenate([xc_ref[...], xh_ref[...]], axis=-1)   # (Cin, tile+128)

    # In-kernel im2col: K shifted taps built once from the small halo-extended
    # buffer and stacked on sublanes -> single fused first-layer matmul.
    taps = [x_ext[:, k:k + tile] for k in range(K)]                # static lane shifts
    im2col = jnp.concatenate(taps, axis=0)                         # (K*Cin, tile) bf16

    # Layer 1 (both heads fused): bf16 x bf16 -> f32 accumulation on the MXU.
    h = jnp.dot(w1_ref[...], im2col, preferred_element_type=jnp.float32)
    h = jnp.maximum(h + b1_ref[...], 0.0)                          # (2H, tile) f32

    # Layer 2 (1x1, block-diagonally packed): rows 0-2 acceptor logits,
    # rows 3-5 donor logits, rows 6-7 zero padding.
    logits = jnp.dot(w2_ref[...], h.astype(jnp.bfloat16),
                     preferred_element_type=jnp.float32) + b2_ref[...]   # (8, tile)

    a1 = logits[1:2, :]
    d2 = logits[5:6, :]
    m_a = jnp.max(logits[0:3, :], axis=0, keepdims=True)           # (1, tile)
    m_d = jnp.max(logits[3:6, :], axis=0, keepdims=True)           # (1, tile)

    # One full-sublane-occupancy exp over the whole max-shifted block.
    row = jax.lax.broadcasted_iota(jnp.int32, logits.shape, 0)
    m8 = jnp.where(row < 3,
                   jnp.broadcast_to(m_a, logits.shape),
                   jnp.broadcast_to(m_d, logits.shape))
    e8 = jnp.exp(logits - m8)                                      # (8, tile)

    sum_a = e8[0:1, :] + e8[1:2, :] + e8[2:3, :]
    sum_d = e8[3:4, :] + e8[4:5, :] + e8[5:6, :]

    acc_lp = (a1 - m_a) - jnp.log(sum_a)        # log p(acceptor class 1)
    don_lp = (d2 - m_d) - jnp.log(sum_d)        # log p(donor class 2)

    # Reuse the exponentials; the divide goes to the near-free EUP reciprocal.
    p_acc = e8[1:2, :] * pl.reciprocal(sum_a, approx=True)
    p_don = e8[5:6, :] * pl.reciprocal(sum_d, approx=True)
    # Clamped "null" stays finite even if p1+p2 >= 1 (torch would emit NaN/-inf).
    null_lp = jnp.log(1.0 - jnp.minimum(p_acc + p_don, 1.0 - 1e-6))

    o_ref[...] = jnp.concatenate([null_lp, acc_lp, don_lp], axis=0)   # (3, tile)


# ---------------------------------------------------------------------------
# Wrapper: layout plumbing + pallas_call + clip
# ---------------------------------------------------------------------------
@functools.partial(jax.jit, static_argnames=("cl_model", "tile_l", "channel_major"))
def splice_model_forward(x, params, *, cl_model, tile_l=16384, channel_major=False):
    """x: (B, L, Cin) one-hot-ish float. Returns (B, L - cl_model, 3) log-probs
    (or (B, 3, L - cl_model) if channel_major=True, skipping the transpose)."""
    B, L, Cin = x.shape
    w1, b1, w2, b2 = params["w1"], params["b1"], params["w2"], params["b2"]
    two_h, kc = w1.shape          # (2H, K*Cin), static under jit
    K = kc // Cin

    # Large lane tiles amortize the ~0.35us per-step pipeline overhead; stay
    # <=16384 so f32 intermediates fit comfortably in v7x's smaller VMEM.
    tile = max(128, min(_round_up(tile_l, 128), _round_up(L, 128)))
    # v7x has 2 TensorCores: keep at least a few grid steps to feed both.
    while tile > 128 and B * _cdiv(L, tile) < 4:
        tile = max(128, ((tile // 2 + 127) // 128) * 128)
    n_tiles = _cdiv(L, tile)
    l_pad = n_tiles * tile
    lp = l_pad + 128              # 128 spare lanes so the j+1 halo block exists
    pad_left = K // 2

    # (B, Cin, lp) bf16, zero-padded: [left conv pad | sequence | zeros].
    xt = jnp.swapaxes(x, 1, 2).astype(jnp.bfloat16)
    x_pad = jnp.pad(xt, ((0, 0), (0, 0), (pad_left, lp - pad_left - L)))

    flops = 2 * B * l_pad * (kc * two_h + two_h * 8)
    bytes_accessed = (B * Cin * lp * 2                      # x read ~once (tiny halo)
                      + B * n_tiles * Cin * 128 * 2         # 128-lane halo re-reads
                      + B * 3 * l_pad * 4                   # f32 output
                      + (w1.size + w2.size) * 2 + (b1.size + b2.size) * 4)
    cost = pl.CostEstimate(flops=flops,
                           transcendentals=8 * B * l_pad,
                           bytes_accessed=bytes_accessed)

    halo_blocks = tile // 128     # halo block index scale (static Python int)

    out = pl.pallas_call(
        _splice_kernel,
        out_shape=jax.ShapeDtypeStruct((B, 3, l_pad), jnp.float32),
        grid_spec=pltpu.PrefetchScalarGridSpec(
            num_scalar_prefetch=0,
            grid=(B, n_tiles),
            in_specs=[
                pl.BlockSpec((None, Cin, tile), lambda b, j: (b, 0, j)),       # tile
                pl.BlockSpec((None, Cin, 128),                                 # 128-lane halo
                             lambda b, j: (b, 0, (j + 1) * halo_blocks)),
                pl.BlockSpec((two_h, kc), lambda b, j: (0, 0)),                # fused W1
                pl.BlockSpec((two_h, 1), lambda b, j: (0, 0)),                 # fused b1
                pl.BlockSpec((8, two_h), lambda b, j: (0, 0)),                 # packed W2
                pl.BlockSpec((8, 1), lambda b, j: (0, 0)),                     # packed b2
            ],
            out_specs=pl.BlockSpec((None, 3, tile), lambda b, j: (b, 0, j)),
        ),
        compiler_params=pltpu.CompilerParams(
            dimension_semantics=("parallel", "parallel"),
            vmem_limit_bytes=32 * 1024 * 1024),
        cost_estimate=cost,
    )(x_pad, x_pad, w1, b1, w2, b2)

    c = cl_model // 2
    if channel_major:
        return out[:, :, c:L - c]                           # (B, 3, L - cl)
    yp = jnp.swapaxes(out, 1, 2)[:, :L, :]                  # (B, L, 3)
    return yp[:, c:L - c]                                   # clip; c == 0 keeps all


# ---------------------------------------------------------------------------
# Deterministic synthetic parameters (stand-ins for the pickled checkpoints)
# ---------------------------------------------------------------------------
def make_params(key, Cin=4, K=5, H=32):
    ks = jax.random.split(key, 6)
    s1 = 1.0 / np.sqrt(K * Cin)
    s2 = 1.0 / np.sqrt(H)
    # Bias class 0 strongly so p(class1)+p(class2) < 1 (non-splice dominates),
    # mirroring real splice models; keeps `null` well away from the clamp.
    head_bias = jnp.array([4.0, -2.0, -2.0], dtype=jnp.float32)

    raw = {
        "w1a": jax.random.normal(ks[0], (K, Cin, H), jnp.float32) * s1,
        "b1a": jax.random.normal(ks[1], (H,), jnp.float32) * 0.1,
        "w2a": jax.random.normal(ks[2], (H, 3), jnp.float32) * s2,
        "b2a": head_bias,
        "w1d": jax.random.normal(ks[3], (K, Cin, H), jnp.float32) * s1,
        "b1d": jax.random.normal(ks[4], (H,), jnp.float32) * 0.1,
        "w2d": jax.random.normal(ks[5], (H, 3), jnp.float32) * s2,
        "b2d": head_bias,
    }

    # Fused / packed weights for the kernel (positions on lanes):
    # w1p[:, k*Cin:(k+1)*Cin] = [acceptor W1[k].T ; donor W1[k].T]  -> (2H, K*Cin)
    w1p = jnp.concatenate(
        [jnp.concatenate([raw["w1a"][k].T, raw["w1d"][k].T], axis=0)
         for k in range(K)], axis=1)                                  # (2H, K*Cin)
    b1 = jnp.concatenate([raw["b1a"], raw["b1d"]]).reshape(2 * H, 1)  # (2H, 1)

    w2 = jnp.zeros((8, 2 * H), jnp.float32)
    w2 = w2.at[0:3, 0:H].set(raw["w2a"].T)
    w2 = w2.at[3:6, H:2 * H].set(raw["w2d"].T)                        # block-diag pack
    b2 = jnp.zeros((8, 1), jnp.float32)
    b2 = b2.at[0:3, 0].set(raw["b2a"])
    b2 = b2.at[3:6, 0].set(raw["b2d"])

    fused = {
        "w1": w1p.astype(jnp.bfloat16),
        "b1": b1,
        "w2": w2.astype(jnp.bfloat16),
        "b2": b2,
    }
    return raw, fused


# ---------------------------------------------------------------------------
# Pure-JAX reference (mirrors the torch module, with the kernel's bf16 rounding)
# ---------------------------------------------------------------------------
def reference_forward(x, raw, cl_model):
    B, L, Cin = x.shape
    K, _, H = raw["w1a"].shape
    pad = K // 2
    xp = jnp.pad(x, ((0, 0), (pad, pad), (0, 0)))
    xp = xp.astype(jnp.bfloat16).astype(jnp.float32)

    def head(w1, b1, w2, b2):
        h = jnp.zeros((B, L, H), jnp.float32)
        for k in range(K):
            wk = w1[k].astype(jnp.bfloat16).astype(jnp.float32)       # (Cin, H)
            h = h + jnp.einsum("blc,ch->blh", xp[:, k:k + L, :], wk)
        h = jnp.maximum(h + b1, 0.0)
        h = h.astype(jnp.bfloat16).astype(jnp.float32)                # kernel feeds bf16 h
        w2f = w2.astype(jnp.bfloat16).astype(jnp.float32)
        logits = jnp.einsum("blh,hc->blc", h, w2f) + b2
        return jax.nn.log_softmax(logits, axis=-1)

    la = head(raw["w1a"], raw["b1a"], raw["w2a"], raw["b2a"])[..., 1:2]
    ld = head(raw["w1d"], raw["b1d"], raw["w2d"], raw["b2d"])[..., 2:3]
    psum = jnp.exp(la) + jnp.exp(ld)
    null = jnp.log(1.0 - jnp.minimum(psum, 1.0 - 1e-6))
    yp = jnp.concatenate([null, la, ld], axis=-1)
    c = cl_model // 2
    return yp[:, c:L - c]


if __name__ == "__main__":
    key = jax.random.PRNGKey(0)
    kx, kp = jax.random.split(key)

    B, L, Cin = 2, 64, 4          # 2 sequences, length 64, 4 nucleotide channels
    cl_model = 16                 # 8 positions clipped off each end

    idx = jax.random.randint(kx, (B, L), 0, Cin)
    x = jax.nn.one_hot(idx, Cin, dtype=jnp.float32)               # (B, L, Cin)

    raw, fused = make_params(kp, Cin=Cin, K=5, H=32)

    y = splice_model_forward(x, fused, cl_model=cl_model)
    y = jax.block_until_ready(y)

    y_ref = reference_forward(x, raw, cl_model)
    np.testing.assert_allclose(np.asarray(y), np.asarray(y_ref),
                               rtol=1e-3, atol=1e-3)
    assert y.shape == (B, L - cl_model, 3)
    assert np.isfinite(np.asarray(y)).all()

    # TODO(synk): real acceptor/donor conv checkpoints (tests/data/*.m) are
    # replaced by deterministic synthetic 2-layer conv heads of matching interface.
    print("KERNEL_OK")
</pallas_src>

<mosaic_0001>
module attributes {stable_mosaic.version = 11 : i64} {
  func.func @_splice_kernel(%arg0: i32, %arg1: i32, %arg2: memref<1x4x128xbf16, #tpu.memory_space<vmem>>, %arg3: memref<1x4x128xbf16, #tpu.memory_space<vmem>>, %arg4: memref<64x20xbf16, #tpu.memory_space<vmem>>, %arg5: memref<64x1xf32, #tpu.memory_space<vmem>>, %arg6: memref<8x64xbf16, #tpu.memory_space<vmem>>, %arg7: memref<8x1xf32, #tpu.memory_space<vmem>>, %arg8: memref<1x3x128xf32, #tpu.memory_space<vmem>>) attributes {dimension_semantics = [#tpu.dimension_semantics<parallel>, #tpu.dimension_semantics<parallel>], iteration_bounds = array<i64: 2, 1>, scalar_prefetch = 0 : i64, scratch_operands = 0 : i64, tpu.core_type = #tpu.core_type<tc>, window_params = [{transform_indices = @transform_0, window_bounds = array<i64: 1, 4, 128>}, {transform_indices = @transform_1, window_bounds = array<i64: 1, 4, 128>}, {pipeline_mode = #tpu.pipeline_mode<synchronous>, transform_indices = @transform_2, window_bounds = array<i64: 64, 20>}, {pipeline_mode = #tpu.pipeline_mode<synchronous>, transform_indices = @transform_3, window_bounds = array<i64: 64, 1>}, {pipeline_mode = #tpu.pipeline_mode<synchronous>, transform_indices = @transform_4, window_bounds = array<i64: 8, 64>}, {pipeline_mode = #tpu.pipeline_mode<synchronous>, transform_indices = @transform_5, window_bounds = array<i64: 8, 1>}, {transform_indices = @transform_6, window_bounds = array<i64: 1, 3, 128>}]} {
    %c0 = arith.constant 0 : index
    %c0_0 = arith.constant 0 : index
    %c0_1 = arith.constant 0 : index
    %0 = vector.load %arg2[%c0, %c0_0, %c0_1] : memref<1x4x128xbf16, #tpu.memory_space<vmem>>, vector<1x4x128xbf16>
    %1 = vector.shape_cast %0 : vector<1x4x128xbf16> to vector<4x128xbf16>
    %c0_2 = arith.constant 0 : index
    %c0_3 = arith.constant 0 : index
    %c0_4 = arith.constant 0 : index
    %2 = vector.load %arg3[%c0_2, %c0_3, %c0_4] : memref<1x4x128xbf16, #tpu.memory_space<vmem>>, vector<1x4x128xbf16>
    %3 = vector.shape_cast %2 : vector<1x4x128xbf16> to vector<4x128xbf16>
    %4 = tpu.concatenate %1, %3 in 1 : vector<4x128xbf16>, vector<4x128xbf16> -> vector<4x256xbf16>
    %5 = vector.extract_strided_slice %4 {offsets = [0, 0], sizes = [4, 128], strides = [1, 1]} : vector<4x256xbf16> to vector<4x128xbf16>
    %6 = vector.extract_strided_slice %4 {offsets = [0, 1], sizes = [4, 128], strides = [1, 1]} : vector<4x256xbf16> to vector<4x128xbf16>
    %7 = vector.extract_strided_slice %4 {offsets = [0, 2], sizes = [4, 128], strides = [1, 1]} : vector<4x256xbf16> to vector<4x128xbf16>
    %8 = vector.extract_strided_slice %4 {offsets = [0, 3], sizes = [4, 128], strides = [1, 1]} : vector<4x256xbf16> to vector<4x128xbf16>
    %9 = vector.extract_strided_slice %4 {offsets = [0, 4], sizes = [4, 128], strides = [1, 1]} : vector<4x256xbf16> to vector<4x128xbf16>
    %10 = tpu.concatenate %5, %6, %7, %8, %9 in 0 : vector<4x128xbf16>, vector<4x128xbf16>, vector<4x128xbf16>, vector<4x128xbf16>, vector<4x128xbf16> -> vector<20x128xbf16>
    %c0_5 = arith.constant 0 : index
    %c0_6 = arith.constant 0 : index
    %11 = vector.load %arg4[%c0_5, %c0_6] : memref<64x20xbf16, #tpu.memory_space<vmem>>, vector<64x20xbf16>
    %cst = arith.constant dense<0.000000e+00> : vector<64x128xf32>
    %12 = tpu.matmul %11, %10, %cst {dimension_numbers = #tpu.dot_dimension_numbers<[1], [0], [0], [1], [0, 0, 1, 1], [], []>} : vector<64x20xbf16>, vector<20x128xbf16>, vector<64x128xf32> -> vector<64x128xf32>
    %c0_7 = arith.constant 0 : index
    %c0_8 = arith.constant 0 : index
    %13 = vector.load %arg5[%c0_7, %c0_8] : memref<64x1xf32, #tpu.memory_space<vmem>>, vector<64x1xf32>
    %14 = vector.broadcast %13 : vector<64x1xf32> to vector<64x128xf32>
    %15 = arith.addf %12, %14 : vector<64x128xf32>
    %cst_9 = arith.constant 0.000000e+00 : f32
    %16 = vector.broadcast %cst_9 : f32 to vector<64x128xf32>
    %17 = arith.maximumf %15, %16 : vector<64x128xf32>
    %c0_10 = arith.constant 0 : index
    %c0_11 = arith.constant 0 : index
    %18 = vector.load %arg6[%c0_10, %c0_11] : memref<8x64xbf16, #tpu.memory_space<vmem>>, vector<8x64xbf16>
    %19 = arith.truncf %17 : vector<64x128xf32> to vector<64x128xbf16>
    %cst_12 = arith.constant dense<0.000000e+00> : vector<8x128xf32>
    %20 = tpu.matmul %18, %19, %cst_12 {dimension_numbers = #tpu.dot_dimension_numbers<[1], [0], [0], [1], [0, 0, 1, 1], [], []>} : vector<8x64xbf16>, vector<64x128xbf16>, vector<8x128xf32> -> vector<8x128xf32>
    %c0_13 = arith.constant 0 : index
    %c0_14 = arith.constant 0 : index
    %21 = vector.load %arg7[%c0_13, %c0_14] : memref<8x1xf32, #tpu.memory_space<vmem>>, vector<8x1xf32>
    %22 = vector.broadcast %21 : vector<8x1xf32> to vector<8x128xf32>
    %23 = arith.addf %20, %22 : vector<8x128xf32>
    %24 = vector.extract_strided_slice %23 {offsets = [1, 0], sizes = [1, 128], strides = [1, 1]} : vector<8x128xf32> to vector<1x128xf32>
    %25 = vector.extract_strided_slice %23 {offsets = [5, 0], sizes = [1, 128], strides = [1, 1]} : vector<8x128xf32> to vector<1x128xf32>
    %26 = vector.extract_strided_slice %23 {offsets = [0, 0], sizes = [3, 128], strides = [1, 1]} : vector<8x128xf32> to vector<3x128xf32>
    %cst_15 = arith.constant dense<0xFF800000> : vector<128xf32>
    %27 = vector.multi_reduction <maximumf>, %26, %cst_15 [0] : vector<3x128xf32> to vector<128xf32>
    %28 = vector.shape_cast %27 : vector<128xf32> to vector<1x128xf32>
    %29 = vector.extract_strided_slice %23 {offsets = [3, 0], sizes = [3, 128], strides = [1, 1]} : vector<8x128xf32> to vector<3x128xf32>
    %cst_16 = arith.constant dense<0xFF800000> : vector<128xf32>
    %30 = vector.multi_reduction <maximumf>, %29, %cst_16 [0] : vector<3x128xf32> to vector<128xf32>
    %31 = vector.shape_cast %30 : vector<128xf32> to vector<1x128xf32>
    %32 = tpu.iota {dimensions = array<i32: 0>} : vector<8x128xi32>
    %c3_i32 = arith.constant 3 : i32
    %33 = vector.broadcast %c3_i32 : i32 to vector<8x128xi32>
    %34 = arith.cmpi slt, %32, %33 : vector<8x128xi32>
    %35 = vector.shape_cast %28 : vector<1x128xf32> to vector<1x128xf32>
    %36 = vector.broadcast %35 : vector<1x128xf32> to vector<8x128xf32>
    %37 = vector.shape_cast %31 : vector<1x128xf32> to vector<1x128xf32>
    %38 = vector.broadcast %37 : vector<1x128xf32> to vector<8x128xf32>
    %39 = arith.select %34, %36, %38 : vector<8x128xi1>, vector<8x128xf32>
    %40 = arith.subf %23, %39 : vector<8x128xf32>
    %41 = math.exp %40 : vector<8x128xf32>
    %42 = vector.extract_strided_slice %41 {offsets = [0, 0], sizes = [1, 128], strides = [1, 1]} : vector<8x128xf32> to vector<1x128xf32>
    %43 = vector.extract_strided_slice %41 {offsets = [1, 0], sizes = [1, 128], strides = [1, 1]} : vector<8x128xf32> to vector<1x128xf32>
    %44 = arith.addf %42, %43 : vector<1x128xf32>
    %45 = vector.extract_strided_slice %41 {offsets = [2, 0], sizes = [1, 128], strides = [1, 1]} : vector<8x128xf32> to vector<1x128xf32>
    %46 = arith.addf %44, %45 : vector<1x128xf32>
    %47 = vector.extract_strided_slice %41 {offsets = [3, 0], sizes = [1, 128], strides = [1, 1]} : vector<8x128xf32> to vector<1x128xf32>
    %48 = vector.extract_strided_slice %41 {offsets = [4, 0], sizes = [1, 128], strides = [1, 1]} : vector<8x128xf32> to vector<1x128xf32>
    %49 = arith.addf %47, %48 : vector<1x128xf32>
    %50 = vector.extract_strided_slice %41 {offsets = [5, 0], sizes = [1, 128], strides = [1, 1]} : vector<8x128xf32> to vector<1x128xf32>
    %51 = arith.addf %49, %50 : vector<1x128xf32>
    %52 = arith.subf %24, %28 : vector<1x128xf32>
    %53 = math.log %46 : vector<1x128xf32>
    %54 = arith.subf %52, %53 : vector<1x128xf32>
    %55 = arith.subf %25, %31 : vector<1x128xf32>
    %56 = math.log %51 : vector<1x128xf32>
    %57 = arith.subf %55, %56 : vector<1x128xf32>
    %58 = vector.extract_strided_slice %41 {offsets = [1, 0], sizes = [1, 128], strides = [1, 1]} : vector<8x128xf32> to vector<1x128xf32>
    %59 = tpu.reciprocal %46 {approx = true} : vector<1x128xf32> -> vector<1x128xf32>
    %60 = arith.mulf %58, %59 : vector<1x128xf32>
    %61 = vector.extract_strided_slice %41 {offsets = [5, 0], sizes = [1, 128], strides = [1, 1]} : vector<8x128xf32> to vector<1x128xf32>
    %62 = tpu.reciprocal %51 {approx = true} : vector<1x128xf32> -> vector<1x128xf32>
    %63 = arith.mulf %61, %62 : vector<1x128xf32>
    %64 = arith.addf %60, %63 : vector<1x128xf32>
    %cst_17 = arith.constant 0.999998986 : f32
    %65 = vector.broadcast %cst_17 : f32 to vector<1x128xf32>
    %66 = arith.minimumf %64, %65 : vector<1x128xf32>
    %cst_18 = arith.constant 1.000000e+00 : f32
    %67 = vector.broadcast %cst_18 : f32 to vector<1x128xf32>
    %68 = arith.subf %67, %66 : vector<1x128xf32>
    %69 = math.log %68 : vector<1x128xf32>
    %70 = tpu.concatenate %69, %54, %57 in 0 : vector<1x128xf32>, vector<1x128xf32>, vector<1x128xf32> -> vector<3x128xf32>
    %c0_19 = arith.constant 0 : index
    %c0_20 = arith.constant 0 : index
    %c0_21 = arith.constant 0 : index
    %71 = vector.load %arg8[%c0_19, %c0_20, %c0_21] : memref<1x3x128xf32, #tpu.memory_space<vmem>>, vector<1x3x128xf32>
    %72 = vector.shape_cast %71 : vector<1x3x128xf32> to vector<3x128xf32>
    %73 = vector.shape_cast %70 : vector<3x128xf32> to vector<1x3x128xf32>
    tpu.vector_store %arg8[%c0_19, %c0_20, %c0_21], %73 {strides = array<i32>} : memref<1x3x128xf32, #tpu.memory_space<vmem>>, vector<1x3x128xf32>,
    return
  }
  func.func @transform_0(%arg0: i32, %arg1: i32) -> (i32, i32, i32) {
    %c0_i32 = arith.constant 0 : i32
    %c0_i32_0 = arith.constant 0 : i32
    return %arg0, %c0_i32, %arg1 : i32, i32, i32
  }
  func.func @transform_1(%arg0: i32, %arg1: i32) -> (i32, i32, i32) {
    %c1_i32 = arith.constant 1 : i32
    %0 = arith.addi %arg1, %c1_i32 : i32
    %c1_i32_0 = arith.constant 1 : i32
    %1 = arith.muli %0, %c1_i32_0 : i32
    %c0_i32 = arith.constant 0 : i32
    %c0_i32_1 = arith.constant 0 : i32
    return %arg0, %c0_i32, %1 : i32, i32, i32
  }
  func.func @transform_2(%arg0: i32, %arg1: i32) -> (i32, i32) {
    %c0_i32 = arith.constant 0 : i32
    %c0_i32_0 = arith.constant 0 : i32
    %c0_i32_1 = arith.constant 0 : i32
    return %c0_i32, %c0_i32_0 : i32, i32
  }
  func.func @transform_3(%arg0: i32, %arg1: i32) -> (i32, i32) {
    %c0_i32 = arith.constant 0 : i32
    %c0_i32_0 = arith.constant 0 : i32
    %c0_i32_1 = arith.constant 0 : i32
    return %c0_i32, %c0_i32_0 : i32, i32
  }
  func.func @transform_4(%arg0: i32, %arg1: i32) -> (i32, i32) {
    %c0_i32 = arith.constant 0 : i32
    %c0_i32_0 = arith.constant 0 : i32
    %c0_i32_1 = arith.constant 0 : i32
    return %c0_i32, %c0_i32_0 : i32, i32
  }
  func.func @transform_5(%arg0: i32, %arg1: i32) -> (i32, i32) {
    %c0_i32 = arith.constant 0 : i32
    %c0_i32_0 = arith.constant 0 : i32
    %c0_i32_1 = arith.constant 0 : i32
    return %c0_i32, %c0_i32_0 : i32, i32
  }
  func.func @transform_6(%arg0: i32, %arg1: i32) -> (i32, i32, i32) {
    %c0_i32 = arith.constant 0 : i32
    %c0_i32_0 = arith.constant 0 : i32
    return %arg0, %c0_i32, %arg1 : i32, i32, i32
  }
}

</mosaic_0001>

<bundles_post_ra>
// kernel: splice_model_forward.1
= control target key start
LH: loop header
LB: loop body
LE: loop exit
PB: predicated region body
PF: predicated region fallthrough
CT: control target
= control target key end

     0   :  { %s919_s21 = smov 0   ;;  %s921_s22 = smov 0   ;;  %s1017_s0 = inlined_call_operand.vmem [shape: bf16[2,4,256], index: 0, kind: input, shape index: {}, may-alias: {0,1}]   ;;  %s1018_s1 = inlined_call_operand.vmem [shape: bf16[2,4,256], index: 1, kind: input, shape index: {}, may-alias: {0,1}]   ;;  %s1019_s2 = inlined_call_operand.vmem [shape: bf16[64,20], index: 2, kind: input, shape index: {}]   ;;  %s1020_s3 = inlined_call_operand.vmem [shape: f32[64,1], index: 3, kind: input, shape index: {}]   ;;  %s1021_s4 = inlined_call_operand.vmem [shape: bf16[8,64], index: 4, kind: input, shape index: {}]   ;;  %s1022_s5 = inlined_call_operand.vmem [shape: f32[8,1], index: 5, kind: input, shape index: {}]   ;;  %s1023_s6 = inlined_call_operand.vmem [shape: f32[2,3,128], index: 6, kind: output, shape index: {}]  }
   0x1   :  { %s923_s23 = smov 0  }
   0x2 LB: > { %s28_s24 = sadd.s32 1, %s871_s22  ;;  %p751_p0 = scmp.ge.s32.totalorder %s875_s23, 1  ;;  %s875_s23 = sphi %s923_s23, %s16_s23   ;;  %s871_s22 = sphi %s921_s22, %s1025_s22   ;;  %s867_s21 = sphi %s919_s21, %s1024_s21  }
   0x3   : > { %p30_p1 = scmp.ge.s32.totalorder %s28_s24, 2  ;;  %p250_p2 = scmp.lt.s32.totalorder %s875_s23, 3 }
   0x5   : > { %s1027_s24 = smov (%p30_p1, %s28_s24), 0  ;;  %p251_p3 = pnand %p751_p0, %p250_p2 }
   0x6   : > { %p294_p4 = scmp.lt.s32.totalorder (!%p251_p3), %s867_s21, 1  ;;  %s877_s30 = smov (!%p251_p3), 124  }
   0x7   : > { %254 = sbr.rel (%p251_p3) target bundleno = 657 (0x291), region = 44  ;;  %s878_s10 = smov (!%p251_p3), 127  }
   0x8   : > { %s879_s13 = smov (!%p251_p3), 126   ;;  %s880_s14 = smov (!%p251_p3), 125  }
   0xc   : > { %s1029_s21 = smov (!%p294_p4, %s867_s21), 1  ;;  %v841_v5 = vld [vmem:[%s1019_s2] sm:$0xff]   ;;  %vm441_vm0 = vcmask 162816   ;;  %v380_v9 = vld [vmem:[%s1020_s3 + $0x38] sm:$0xff]  ;;  %v379_v10 = vld [vmem:[%s1020_s3 + $0x30] sm:$0xff]  ;;  %v881_v11 = vmov 0  }
   0xd   : > { %s937_s25 = sshll.u32 %s1029_s21, 2  ;;  %787 = vmatprep.mubr.msk.bf16.mxu0 %vm441_vm0, %v841_v5  ;;  %840 = vset.pattern.permute.xlu1 %v881_v11  ;;  %v378_v12 = vld [vmem:[%s1020_s3 + $0x28] sm:$0xff]  ;;  %v377_v13 = vld [vmem:[%s1020_s3 + $0x20] sm:$0xff]  ;;  %v376_v14 = vld [vmem:[%s1020_s3 + $0x18] sm:$0xff]  ;;  %vm352_vm1 = vcmask 1014784   ;;  %vm354_vm2 = vcmask 1041408  }
   0xe   : > { %s301_s28 = scalar_lea.vmem %s1017_s0, %s937_s25  ;;  %s770_s29 = sadd.s32 2, %s937_s25  ;;  %839 = vset.pattern.permute.xlu0 %v881_v11  ;;  %v375_v15 = vld [vmem:[%s1020_s3 + $0x10] sm:$0xff]  ;;  %v374_v16 = vld [vmem:[%s1020_s3 + $0x8] sm:$0xff]  ;;  %v373_v17 = vld [vmem:[%s1020_s3] sm:$0xff]  ;;  %vm330_vm3 = vcmask 1039360   ;;  %vm338_vm4 = vcmask 1031168  }
   0xf   : > { %v943_v0 = vld [vmem:[%s301_s28] sm:$0x3]  ;;  %s310_s9 = scalar_lea.vmem %s1018_s1, %s770_s29  ;;  %vm346_vm5 = vcmask 1022976   ;;  %vm358_vm6 = vcmask 1043456   ;;  %vm361_vm7 = vcmask 1045504   ;;  %v842_v35 = vld [vmem:[%s1019_s2 + $0x8] sm:$0xff]   ;;  %s318_s27 = scalar_lea.vmem %s1023_s6, %s937_s25 }
  0x10   : > { %348 = vrot.lane.b32.xlu0 %v943_v0, %s877_s30  ;;  %v324_v1 = vrot.slane %v943_v0, 6  ;;  %v321_v2 = vld [vmem:[%s310_s9] sm:$0x3]  ;;  %v332_v4 = vrot.slane %v943_v0, 4  ;;  %v340_v7 = vrot.slane %v943_v0, 2  ;;  %v843_v36 = vld [vmem:[%s1019_s2 + $0x10] sm:$0xff]  }
  0x11   : > { %v325_v3 = vrot.slane %v321_v2, 6  ;;  %v333_v6 = vrot.slane %v321_v2, 4  ;;  %v341_v8 = vrot.slane %v321_v2, 2  ;;  %v535_v18 = vld [vmem:[%s1022_s5] sm:$0xff]  ;;  %v844_v37 = vld [vmem:[%s1019_s2 + $0x18] sm:$0xff]   ;;  %v882_v38 = vmov 0.0  }
  0x12   : > { %326 = vrot.lane.b32.xlu1 %v324_v1, %s878_s10  ;;  %795 = vmatprep.subr.bf16.mxu1 %v882_v38  ;;  %vm883_vm8 = vmmov 0   ;;  %v530_v11 = vld [vmem:[%s1021_s4] sm:$0xf]  ;;  %vm541_vm9 = vcmask 523264   ;;  %vm585_vm10 = vcmask 1042432   ;;  %vm593_vm11 = vcmask 1045507  }
  0x13   : > { %803 = vmatprep.mubr.msk.bf16.mxu1 %vm883_vm8, %v882_v38  ;;  %vm648_vm13 = vcmask 1040384  }
  0x14   : > { %350 = vrot.lane.b32.xlu0 %v321_v2, %s877_s30 }
  0x16   : > { %328 = vrot.lane.b32.xlu1 %v325_v3, %s878_s10 }
  0x18   : > { %334 = vrot.lane.b32.xlu0 %v332_v4, %s879_s13 }
  0x1a   : > { %336 = vrot.lane.b32.xlu1 %v333_v6, %s879_s13 }
  0x1c   : > { %342 = vrot.lane.b32.xlu0 %v340_v7, %s880_s14 }
  0x1e   : > { %344 = vrot.lane.b32.xlu1 %v341_v8, %s880_s14 }
  0x20   : > { %413 = vperm.xlu0 %839, %v379_v10  }
  0x22   : > { %418 = vperm.xlu1 %840, %v380_v9  }
  0x24   : > { %408 = vperm.xlu0 %839, %v378_v12  }
  0x26   : > { %403 = vperm.xlu1 %840, %v377_v13  }
  0x28   : > { %398 = vperm.xlu0 %839, %v376_v14  }
  0x2a   : > { %393 = vperm.xlu1 %840, %v375_v15  }
  0x2c   : > { %388 = vperm.xlu0 %839, %v374_v16  }
  0x2e   : > { %383 = vperm.xlu1 %840, %v373_v17  }
  0x32   : > { %538 = vperm.xlu1 %840, %v535_v18  }
  0x82   : > { %v349_v19 = vpop.permute.xlu0 %348 }
  0x84   : > { %v327_v20 = vpop.permute.xlu1 %326 }
  0x86   : > { %v351_v21 = vpop.permute.xlu0 %350 }
  0x87   : > { %v353_v22 = vsel %vm352_vm1, %v349_v19, %v351_v21  ;;  %v601_v21 = vlaneseq }
  0x88   : > { %807 = vmatprep.subr.msk.bf16.mxu0 %vm354_vm2, %v353_v22  ;;  %v329_v23 = vpop.permute.xlu1 %328  ;;  %v455_v24 = vsel %vm354_vm2, %v353_v22, 0 }
  0x89   : > { %784 = vmatpush3.bf16.msra.mxu0 %v455_v24  ;;  %v331_v27 = vsel %vm330_vm3, %v327_v20, %v329_v23 }
  0x8a   : > { %v335_v25 = vpop.permute.xlu0 %334  ;;  %v357_v30 = vsel %vm354_vm2, %v943_v0, %v331_v27  ;;  %v602_v27 = vshrl.u32 %v601_v21, 7 }
  0x8c   : > { %v337_v26 = vpop.permute.xlu1 %336  ;;  %vm603_vm12 = vcmp.lt.s32.totalorder %v602_v27, 3 }
  0x8d   : > { %v339_v28 = vsel %vm338_vm4, %v335_v25, %v337_v26 }
  0x8e   : > { %v343_v29 = vpop.permute.xlu0 %342  ;;  %v360_v33 = vsel %vm358_vm6, %v357_v30, %v339_v28 }
  0x90   : > { %v345_v31 = vpop.permute.xlu1 %344 }
  0x91   : > { %v347_v32 = vsel %vm346_vm5, %v343_v29, %v345_v31 }
  0x92   : > { %v363_v34 = vsel %vm361_vm7, %v360_v33, %v347_v32 }
  0x93   : > { %785 = vmatprep.subr.bf16.mxu0 %v363_v34 }
  0x94   : > { %786 = vmatpush3.bf16.msra.mxu0 %v363_v34 }
  0x97   : > { %788 = vmatmul.mubr.msk.bf16.vlgmr.msra.gmra.mxu0 %vm441_vm0, %v842_v35 }
  0x98   : > { %791 = vmatprep.mubr.msk.bf16.mxu0 %vm441_vm0, %v843_v36 }
  0x9b   : > { %v414_v39 = vpop.permute.xlu0 %413 }
  0x9d   : > { %v419_v41 = vpop.permute.xlu1 %418 }
  0x9f   : > { %792 = vmatmul.mubr.msk.bf16.gmra.mxu0 %vm441_vm0, %v844_v37  ;;  %v409_v44 = vpop.permute.xlu0 %408 }
  0xa1   : > { %v404_v46 = vpop.permute.xlu1 %403 }
  0xa3   : > { %v399_v50 = vpop.permute.xlu0 %398 }
  0xa5   : > { %v394_v53 = vpop.permute.xlu1 %393 }
  0xa7   : > { %v389_v62 = vpop.permute.xlu0 %388 }
  0xa9   : > { %v384_v1 = vpop.permute.xlu1 %383 }
  0xad   : > { %v539_v12 = vpop.permute.xlu1 %538 }
 0x157   : > { %v789_v40 = vpop.f32.mrf.mxu0 }
 0x158   : > { %v500_v63 = vadd.f32 %v789_v40, %v394_v53 }
 0x159   : > { %v491_v42 = vpop.f32.mrf.mxu0 }
 0x15a   : > { %v524_v5 = vmax.f32 %v500_v63, 0.0  ;;  %v492_v6 = vadd.f32 %v491_v42, %v384_v1 }
 0x15b   : > { %v790_v43 = vpop.f32.mrf.mxu0 }
 0x15c   : > { %v503_v59 = vadd.f32 %v790_v43, %v399_v50  ;;  %v522_v9 = vmax.f32 %v492_v6, 0.0 }
 0x15d   : > { %v494_v45 = vpop.f32.mrf.mxu0 }
 0x15e   : > { %v525_v2 = vmax.f32 %v503_v59, 0.0  ;;  %v495_v3 = vadd.f32 %v494_v45, %v389_v62 }
 0x15f   : > { %v793_v47 = vpop.f32.mrf.mxu0 }
 0x160   : > { %v516_v49 = vadd.f32 %v793_v47, %v414_v39  ;;  %v532_v7 = vpack.c.bf16 %v525_v2, %v524_v5  ;;  %v523_v8 = vmax.f32 %v495_v3, 0.0 }
 0x161   : > { %v507_v48 = vpop.f32.mrf.mxu0 }
 0x162   : > { %v528_v55 = vmax.f32 %v516_v49, 0.0  ;;  %v508_v56 = vadd.f32 %v507_v48, %v404_v46  ;;  %v531_v10 = vpack.c.bf16 %v523_v8, %v522_v9 }
 0x163   : > { %v794_v51 = vpop.f32.mrf.mxu0 }
 0x164   : > { %v519_v52 = vadd.f32 %v794_v51, %v419_v41  ;;  %v526_v0 = vmax.f32 %v508_v56, 0.0 }
 0x165   : > { %v510_v54 = vpop.f32.mrf.mxu0 }
 0x166   : > { %v529_v57 = vmax.f32 %v519_v52, 0.0  ;;  %v511_v58 = vadd.f32 %v510_v54, %v409_v44 }
 0x168   : > { %v527_v60 = vmax.f32 %v511_v58, 0.0  ;;  %v534_v61 = vpack.c.bf16 %v529_v57, %v528_v55 }
 0x16a   : > { %796 = vmatpush3.bf16.msra.mxu1 %v534_v61  ;;  %v533_v4 = vpack.c.bf16 %v527_v60, %v526_v0 }
 0x16b   : > { %797 = vmatprep.subr.bf16.mxu1 %v882_v38 }
 0x16e   : > { %798 = vmatpush3.bf16.msra.mxu1 %v533_v4 }
 0x16f   : > { %799 = vmatprep.subr.bf16.mxu1 %v882_v38 }
 0x172   : > { %800 = vmatpush3.bf16.msra.mxu1 %v532_v7 }
 0x173   : > { %801 = vmatprep.subr.bf16.mxu1 %v882_v38 }
 0x176   : > { %802 = vmatpush3.bf16.msra.mxu1 %v531_v10 }
 0x179   : > { %804 = vmatmul.mubr.msk.bf16.vlgmr.msra.gmra.mxu1 %vm541_vm9, %v530_v11 }
 0x239   : > { %v579_v13 = vpop.f32.mrf.mxu1 }
 0x23a   : > { %v580_v14 = vadd.f32 %v579_v13, %v539_v12 }
 0x23b   : > { %v805_v15 = vpop.f32.mrf.mxu1 }
 0x23c   : > { %v586_v16 = vsel %vm585_vm10, %v580_v14, -inf  ;;  %v594_v17 = vsel %vm593_vm11, %v580_v14, -inf }
 0x23d   : > { %v587_v18 = vrot.slane %v586_v16, 4  ;;  %v595_v19 = vrot.slane %v594_v17, 4  ;;  %v582_v20 = vpop.f32.mrf.mxu1 }
 0x23f   : > { %v588_v22 = vmax.f32 %v586_v16, %v587_v18  ;;  %v596_v23 = vmax.f32 %v594_v17, %v595_v19  ;;  %v806_v24 = vpop.f32.mrf.mxu1 }
 0x241   : > { %v589_v25 = vrot.slane %v588_v22, 2  ;;  %v597_v26 = vrot.slane %v596_v23, 2 }
 0x243   : > { %v590_v28 = vmax.f32 %v588_v22, %v589_v25  ;;  %v598_v29 = vmax.f32 %v596_v23, %v597_v26 }
 0x245   : > { %v591_v30 = vrot.slane %v590_v28, 1  ;;  %v599_v31 = vrot.slane %v598_v29, 1 }
 0x247   : > { %v592_v32 = vmax.f32 %v590_v28, %v591_v30  ;;  %v600_v33 = vmax.f32 %v598_v29, %v599_v31 }
 0x249   : > { %v604_v34 = vsel %vm603_vm12, %v592_v32, %v600_v33  ;;  %v615_v35 = vsub.f32 %v580_v14, %v592_v32  ;;  %v622_v36 = vsub.f32 %v580_v14, %v600_v33 }
 0x24a   : > { %v605_v37 = vsub.f32 %v580_v14, %v604_v34 }
 0x24c   : > { %v606_v38 = vmul.f32 1.442695, %v605_v37 }
 0x24e   : > { %845 = vpow2.f32 %v606_v38 }
 0x25b   : > { %v846_v39 = vpop.eup %845 }
 0x25c   : > { %v609_v40 = vrot.slane %v846_v39, 1  ;;  %v612_v42 = vrot.slane %v846_v39, 2 }
 0x25e   : > { %v611_v41 = vadd.f32 %v846_v39, %v609_v40 }
 0x260   : > { %v614_v43 = vadd.f32 %v612_v42, %v611_v41 }
 0x262   : > { %847 = vrcp.f32 %v614_v43 }
 0x263   : > { %849 = vlog2.f32 %v614_v43 }
 0x26f   : > { %v848_v44 = vpop.eup %847 }
 0x270   : > { %v628_v45 = vrot.slane %v848_v44, 7  ;;  %v631_v46 = vrot.slane %v848_v44, 6  ;;  %v850_v53 = vpop.eup %849 }
 0x271   : > { %v617_v54 = vmul.f32 0.6931472, %v850_v53 }
 0x272   : > { %v633_v47 = vmul.f32 %v846_v39, %v631_v46  ;;  %v630_v48 = vmul.f32 %v846_v39, %v628_v45 }
 0x273   : > { %v623_v55 = vrot.slane %v617_v54, 6  ;;  %v619_v56 = vrot.slane %v617_v54, 7 }
 0x274   : > { %v635_v49 = vrot.slane %v633_v47, 4 }
 0x275   : > { %v625_v58 = vsub.f32 %v622_v36, %v623_v55  ;;  %v621_v60 = vsub.f32 %v615_v35, %v619_v56 }
 0x276   : > { %v637_v50 = vadd.f32 %v635_v49, %v630_v48 }
 0x277   : > { %v646_v62 = vrot.slane %v625_v58, 3 }
 0x278   : > { %v638_v51 = vmin.f32 %v637_v50, 0.999999 }
 0x27a   : > { %v639_v52 = vsub.f32 1.0, %v638_v51 }
 0x27c   : > { %851 = vlog2.f32 %v639_v52 }
 0x289   : > { %v852_v57 = vpop.eup %851 }
 0x28a   : > { %v641_v59 = vmul.f32 0.6931472, %v852_v57 }
 0x28c   : > { %v643_v61 = vrot.slane %v641_v59, 1 }
 0x28e   : > { %v649_v63 = vsel %vm648_vm13, %v643_v61, %v621_v60 }
 0x28f   : > { %v650_v0 = vsel %vm354_vm2, %v649_v63, %v646_v62 }
 0x290   : > { %651 = vst [vmem:[%s318_s27] sm:$0x7] %v650_v0 }
 0x291 PF: > { %s16_s23 = sadd.s32 1, %s875_s23   ;;  %s1024_s21 = smov %s871_s22 }
 0x292   : > { %p13_p5 = scmp.ge.s32.totalorder %s16_s23, 4   ;;  %s1025_s22 = smov %s1027_s24 }
 0x294   :  { %15 = sbr.rel (!%p13_p5) target bundleno = 2 (0x2), region = 77 }

</bundles_post_ra>
